<compile_context>
chip_gen: v5e
topology: v5e:2x2
jax: 0.10.0
libtpu: 0.0.40
codegen_flags: <defaults>
</compile_context>

<pallas_src>
import functools

import numpy as np
import jax
import jax.numpy as jnp
from jax import lax
from jax.experimental import pallas as pl
from jax.experimental.pallas import tpu as pltpu


def get_qsc_channel(nb_classes: int, epsilon: float = 0.5) -> np.ndarray:
    """q-ary symmetric channel transition matrix (deterministic init)."""
    p = np.ones((nb_classes, nb_classes), dtype=np.float32) * (
        epsilon / (nb_classes - 1)
    )
    np.fill_diagonal(p, 1.0 - epsilon)
    return p


# --------------------------------------------------------------------------
# General path (works for any / trained weight): y = x @ W.T on the MXU.
# --------------------------------------------------------------------------
def _noise_matmul_kernel(x_ref, w_ref, o_ref):
    # Contract x's feature dim with W's *input* dim (dim 1), i.e. x @ W.T,
    # so no wrapper-side transpose / extra HBM weight pass is needed.
    o_ref[...] = lax.dot_general(
        x_ref[...],
        w_ref[...],
        dimension_numbers=(((1,), (1,)), ((), ())),
        preferred_element_type=jnp.float32,
    ).astype(o_ref.dtype)


def noise_layer_forward(x: jax.Array, weight: jax.Array, *, tb_max: int = 512):
    """NoiseLayer forward: y = x @ weight.T (no bias).

    x:      (B, C) float32
    weight: (C, C) float32  -- PyTorch Linear weight layout (out, in)
    """
    b, c = x.shape
    # Batch tile: whole batch if small (full-extent block satisfies the
    # (8,128) rule); otherwise a multiple-of-8 tile so the grid software-
    # pipelines x while the weight stays VMEM-resident across steps.
    tb = b if b <= tb_max else tb_max
    grid = (pl.cdiv(b, tb),)

    return pl.pallas_call(
        _noise_matmul_kernel,
        out_shape=jax.ShapeDtypeStruct((b, c), x.dtype),
        grid=grid,
        in_specs=[
            pl.BlockSpec((tb, c), lambda i: (i, 0)),   # streamed x tiles
            pl.BlockSpec((c, c), lambda i: (0, 0)),    # weight, VMEM-resident
        ],
        out_specs=pl.BlockSpec((tb, c), lambda i: (i, 0)),
        compiler_params=pltpu.CompilerParams(
            dimension_semantics=("parallel",),
        ),
    )(x, weight)


# --------------------------------------------------------------------------
# Fast path for the frozen qSC init (trainable=False, p_yp_given_y=None):
#   W = (1 - eps - eps/(C-1)) * I + (eps/(C-1)) * J
#   y = a * x + b * sum(x, axis=-1, keepdims=True)
# Pure streaming op (XLU row-sum + VPU FMA); no MXU, no weight DMA.
# --------------------------------------------------------------------------
def _noise_qsc_kernel(x_ref, o_ref, *, a: float, b: float):
    x = x_ref[...]
    row_sum = jnp.sum(x, axis=-1, keepdims=True)
    o_ref[...] = (a * x + b * row_sum).astype(o_ref.dtype)


def noise_layer_forward_qsc(
    x: jax.Array, epsilon: float = 0.5, *, tb_max: int = 512
):
    """NoiseLayer forward specialized to the deterministic qSC weight."""
    bsz, c = x.shape
    b_coef = float(epsilon / (c - 1))
    a_coef = float(1.0 - epsilon - b_coef)

    tb = bsz if bsz <= tb_max else tb_max
    grid = (pl.cdiv(bsz, tb),)

    kernel = functools.partial(_noise_qsc_kernel, a=a_coef, b=b_coef)
    return pl.pallas_call(
        kernel,
        out_shape=jax.ShapeDtypeStruct((bsz, c), x.dtype),
        grid=grid,
        in_specs=[pl.BlockSpec((tb, c), lambda i: (i, 0))],
        out_specs=pl.BlockSpec((tb, c), lambda i: (i, 0)),
        compiler_params=pltpu.CompilerParams(
            dimension_semantics=("parallel",),
        ),
    )(x)


if __name__ == "__main__":
    nb_classes = 16
    batch = 8

    key = jax.random.PRNGKey(0)
    kx, kw = jax.random.split(key)
    x = jax.random.normal(kx, (batch, nb_classes), dtype=jnp.float32)

    # 1) Deterministic qSC init (exactly what NoiseLayer.__init__ builds).
    w_qsc = jnp.asarray(get_qsc_channel(nb_classes, 0.5))

    y_gen = jax.block_until_ready(noise_layer_forward(x, w_qsc))
    np.testing.assert_allclose(
        np.asarray(y_gen), np.asarray(x @ w_qsc.T), rtol=1e-5, atol=1e-5
    )

    y_fast = jax.block_until_ready(noise_layer_forward_qsc(x, 0.5))
    np.testing.assert_allclose(
        np.asarray(y_fast), np.asarray(x @ w_qsc.T), rtol=1e-5, atol=1e-5
    )

    # 2) Non-symmetric weight to keep the in-kernel transpose honest
    #    (qSC matrix is symmetric, so it would mask a W vs. W.T bug).
    w_rand = jax.random.normal(kw, (nb_classes, nb_classes), dtype=jnp.float32)
    y_rand = jax.block_until_ready(noise_layer_forward(x, w_rand))
    np.testing.assert_allclose(
        np.asarray(y_rand), np.asarray(x @ w_rand.T), rtol=1e-5, atol=1e-5
    )

    print("KERNEL_OK")
</pallas_src>

<mosaic_0001>
module attributes {stable_mosaic.version = 11 : i64} {
  func.func @_noise_matmul_kernel(%arg0: i32, %arg1: memref<8x16xf32, #tpu.memory_space<vmem>>, %arg2: memref<16x16xf32, #tpu.memory_space<vmem>>, %arg3: memref<8x16xf32, #tpu.memory_space<vmem>>) attributes {dimension_semantics = [#tpu.dimension_semantics<parallel>], iteration_bounds = array<i64: 1>, scalar_prefetch = 0 : i64, scratch_operands = 0 : i64, tpu.core_type = #tpu.core_type<tc>, window_params = [{transform_indices = @transform_0, window_bounds = array<i64: 8, 16>}, {pipeline_mode = #tpu.pipeline_mode<synchronous>, transform_indices = @transform_1, window_bounds = array<i64: 16, 16>}, {transform_indices = @transform_2, window_bounds = array<i64: 8, 16>}]} {
    %c0 = arith.constant 0 : index
    %c0_0 = arith.constant 0 : index
    %0 = vector.load %arg1[%c0, %c0_0] : memref<8x16xf32, #tpu.memory_space<vmem>>, vector<8x16xf32>
    %c0_1 = arith.constant 0 : index
    %c0_2 = arith.constant 0 : index
    %1 = vector.load %arg2[%c0_1, %c0_2] : memref<16x16xf32, #tpu.memory_space<vmem>>, vector<16x16xf32>
    %cst = arith.constant dense<0.000000e+00> : vector<8x16xf32>
    %2 = tpu.matmul %0, %1, %cst {dimension_numbers = #tpu.dot_dimension_numbers<[1], [1], [0], [0], [0, 0, 1, 0], [], []>} : vector<8x16xf32>, vector<16x16xf32>, vector<8x16xf32> -> vector<8x16xf32>
    %c0_3 = arith.constant 0 : index
    %c0_4 = arith.constant 0 : index
    %3 = vector.load %arg3[%c0_3, %c0_4] : memref<8x16xf32, #tpu.memory_space<vmem>>, vector<8x16xf32>
    tpu.vector_store %arg3[%c0_3, %c0_4], %2 {strides = array<i32>} : memref<8x16xf32, #tpu.memory_space<vmem>>, vector<8x16xf32>,
    return
  }
  func.func @transform_0(%arg0: i32) -> (i32, i32) {
    %c0_i32 = arith.constant 0 : i32
    %c0_i32_0 = arith.constant 0 : i32
    return %arg0, %c0_i32 : i32, i32
  }
  func.func @transform_1(%arg0: i32) -> (i32, i32) {
    %c0_i32 = arith.constant 0 : i32
    %c0_i32_0 = arith.constant 0 : i32
    %c0_i32_1 = arith.constant 0 : i32
    return %c0_i32, %c0_i32_0 : i32, i32
  }
  func.func @transform_2(%arg0: i32) -> (i32, i32) {
    %c0_i32 = arith.constant 0 : i32
    %c0_i32_0 = arith.constant 0 : i32
    return %arg0, %c0_i32 : i32, i32
  }
}

</mosaic_0001>

<bundles_post_ra>
// kernel: tpu_custom_call.1
= control target key start
LH: loop header
LB: loop body
LE: loop exit
PB: predicated region body
PF: predicated region fallthrough
CT: control target
= control target key end

     0   :  { %7 = vsyncpa [#allocation3], 0  ;;  %s209_s0 = inlined_call_operand.hbm [shape: f32[8,16], index: 0, kind: input, shape index: {}]   ;;  %s210_s1 = inlined_call_operand.hbm [shape: f32[16,16], index: 1, kind: input, shape index: {}]   ;;  %s211_s2 = inlined_call_operand.hbm [shape: f32[8,16], index: 2, kind: output, shape index: {}]  }
   0x1   :  { %8 = vsyncpa [#allocation6], 0 }
   0x2   :  { %9 = vsyncpa [#allocation4], 0  ;;  %s15_s11 = sshll.u32 %s209_s0, 4  ;;  %s180_s12 = smov [#allocation2]   ;;  %s16_s11 = int_to_ptr.hbm [resolvable:$true] %s15_s11 }
   0x3   :  { %s17_s13 = sshll.u32 %s180_s12, 4  ;;  %s25_s16 = sshll.u32 %s210_s1, 4  ;;  %s18_s13 = int_to_ptr.vmem [resolvable:$true] %s17_s13  ;;  %s26_s16 = int_to_ptr.hbm [resolvable:$true] %s25_s16 }
   0x4   :  { %20 = dma.hbm_to_vmem [thread:$0]  %s16_s11, 128, %s18_s13, [#allocation3]  }
   0x5   :  { %s181_s17 = smov [#allocation5]   ;;  %s182_s19 = smov 128  }
   0x6   :  { %s27_s18 = sshll.u32 %s181_s17, 4  ;;  %s183_s20 = smov 8   ;;  %s28_s18 = int_to_ptr.vmem [resolvable:$true] %s27_s18 }
   0x7   :  { %33 = dma.hbm_to_vmem [thread:$0]  %s26_s16, 256, %s28_s18, [#allocation6], %s182_s19, %s182_s19, %s183_s20  }
   0x8   :  { %174 = dma.done.wait [#allocation3], 128  }
   0x9   :  { %175 = vsyncadd [#allocation3], 4294967168 }
   0xa   :  { %176 = dma.done.wait [#allocation6], 256  }
   0xb   :  { %177 = vsyncadd [#allocation6], 4294967040  ;;  %vm45_vm0 = vcmask 130048   ;;  %v44_v0 = vld [vmem:[#allocation5 + $0x8] sm:$0xff]  ;;  %v43_v1 = vld [vmem:[#allocation5] sm:$0xff]  ;;  %s184_s0 = smov [#allocation7]  }
   0xc   :  { %94 = vmatpush.xpose.msk.msra.mxu0 %vm45_vm0, %v44_v0  ;;  %v42_v2 = vld [vmem:[#allocation2] sm:$0xff]  ;;  %s81_s1 = sshll.u32 %s184_s0, 4  ;;  %s83_s23 = sshll.u32 %s211_s2, 4  ;;  %s82_s1 = int_to_ptr.vmem [resolvable:$true] %s81_s1  ;;  %s84_s23 = int_to_ptr.hbm [resolvable:$true] %s83_s23 }
  0x10   :  { %95 = vmatpush.xpose.msk.msra.mxu0 %vm45_vm0, %v43_v1 }
  0x13   :  { %96 = vmatmul.msk.f32.vlgmr.msra.gmra.mxu0 %vm45_vm0, %v42_v2 }
  0x90   :  { %v72_v3 = vpop.f32.mrf.mxu0 }
  0x91   :  { %75 = vst.msk [vmem:[#allocation7] sm:$0xff] %vm45_vm0, %v72_v3 }
  0x92   :  { %86 = dma.vmem_to_hbm [thread:$0]  %s82_s1, 128, %s84_s23, [#allocation4]  }
  0x93   :  { %178 = dma.done.wait [#allocation4], 128  }
  0x94   :  { %179 = vsyncadd [#allocation4], 4294967168 }
  0x95   :  { %91 = vsyncpa [#allocation3], 1 }
  0x96   :  { %92 = vsyncpa [#allocation6], 1 }
  0x97   :  { %93 = vsyncpa [#allocation4], 1 }

</bundles_post_ra>
